<compile_context>
chip_gen: v6e
topology: v6e:2x2x1
jax: 0.10.0
libtpu: 0.0.40
codegen_flags: <defaults>
</compile_context>

<pallas_src>
from typing import NamedTuple

import jax
import jax.numpy as jnp
from jax.experimental import pallas as pl
from jax.experimental.pallas import tpu as pltpu


# ----------------------------- Pallas kernel ------------------------------ #
def _stl_attention_kernel(x_ref, wq_ref, kblk_ref, bias_ref, sel_ref,
                          vblk_ref, expand_ref, o_ref):
    """One grid step == one block of flattened query rows.

    x_ref      : [Mb, E]     bf16 flattened queries (N*T_q rows, blocked)
    wq_ref     : [E, E]      bf16 W_query^T pre-scaled by 1/sqrt(d_k)
    kblk_ref   : [E, S]      bf16 block-diagonal K^T (per-head keys)
    bias_ref   : [1, S]      f32  additive bias (0 real token, -1e30 padded)
    sel_ref    : [S, Hp]     bf16 0/1 per-head denominator selector
    vblk_ref   : [S, E]      bf16 block-diagonal V (padded rows zero)
    expand_ref : [Hp, E]     f32  0/1 head -> output-column expander
    o_ref      : [Mb, E]     f32  head-concatenated attention output
    """
    # Q projection: one [Mb, E] x [E, E] matmul, bf16 operands, f32 accumulate.
    q = jnp.dot(x_ref[...], wq_ref[...], preferred_element_type=jnp.float32)

    # All-head scores in ONE matmul against the block-diagonal K^T.
    scores = jnp.dot(q.astype(jnp.bfloat16), kblk_ref[...],
                     preferred_element_type=jnp.float32)          # [Mb, S]

    # Precomputed additive bias handles the padded token columns (no iota,
    # no int32 modulo, no select).  Row-global max subtraction: shift-invariant
    # per head, identical result.
    scores = scores + bias_ref[...]
    scores = scores - jnp.max(scores, axis=-1, keepdims=True)
    e = jnp.exp(scores)                                           # [Mb, S] f32
    e16 = e.astype(jnp.bfloat16)

    # Compact per-head denominators: [Mb, S] x [S, Hp] -> [Mb, Hp]; reciprocal
    # over only Mb*Hp elements on the EUP.  Padded head columns have denom 0;
    # the max() guard keeps the reciprocal finite (it is later multiplied by
    # zero rows of the expander).
    denom = jnp.dot(e16, sel_ref[...], preferred_element_type=jnp.float32)
    recip = pl.reciprocal(jnp.maximum(denom, 1e-30), approx=True)  # [Mb, Hp]

    # Unnormalized head-concatenated output in ONE matmul against the
    # block-diagonal V (padded token rows of V are zero).
    out_un = jnp.dot(e16, vblk_ref[...],
                     preferred_element_type=jnp.float32)           # [Mb, E]

    # Broadcast each head's reciprocal across its dh output columns with a tiny
    # 0/1 matmul (f32, exact), then normalize.
    scale = jnp.dot(recip, expand_ref[...],
                    preferred_element_type=jnp.float32)            # [Mb, E]
    o_ref[...] = (out_un * scale).astype(o_ref.dtype)


# ----------------------- parameter-setup preprocessing --------------------- #
class STLParams(NamedTuple):
    wq_b: jax.Array       # [E, E]    bf16, 1/sqrt(d_k) folded in
    kblock_b: jax.Array   # [E, S]    bf16, block-diagonal K^T
    bias_f: jax.Array     # [1, S]    f32, 0 / -1e30 padded-column bias
    sel_b: jax.Array      # [S, Hp]   bf16, per-head denominator selector
    vblock_b: jax.Array   # [S, E]    bf16, block-diagonal V
    expand_f: jax.Array   # [Hp, E]   f32, head -> output-column expander
    num_heads: int
    t_kp: int
    hp: int
    token_num: int
    E: int


def prepare_stl_params(embed, wq_t, wk_t, wv_t, *, num_heads: int) -> STLParams:
    """One-time, batch-invariant preprocessing (the 'parameter setup' step)."""
    token_num, key_dim = embed.shape
    E = wq_t.shape[1]
    assert E % num_heads == 0 and key_dim == E // num_heads
    dh = E // num_heads

    keys_in = jnp.tanh(embed)                      # [T_k, dh]  (F.tanh(embed))
    k = keys_in @ wk_t                             # [T_k, E]
    v = keys_in @ wv_t                             # [T_k, E]

    # Minimal per-head token padding (sublane multiple only) — scores/e are
    # vreg intermediates, not stored outputs, so no 128-lane requirement.
    t_kp = ((token_num + 7) // 8) * 8
    S = num_heads * t_kp
    hp = ((num_heads + 7) // 8) * 8                # sublane-padded head count

    kblock = jnp.zeros((E, S), jnp.float32)
    vblock = jnp.zeros((S, E), jnp.float32)
    sel = jnp.zeros((S, hp), jnp.float32)
    expand = jnp.zeros((hp, E), jnp.float32)
    bias = jnp.full((1, S), -1e30, jnp.float32)
    for h in range(num_heads):
        kh = k[:, h * dh:(h + 1) * dh]             # [T_k, dh]
        vh = v[:, h * dh:(h + 1) * dh]             # [T_k, dh]
        kblock = kblock.at[h * dh:(h + 1) * dh,
                           h * t_kp:h * t_kp + token_num].set(kh.T)
        vblock = vblock.at[h * t_kp:h * t_kp + token_num,
                           h * dh:(h + 1) * dh].set(vh)
        sel = sel.at[h * t_kp:h * t_kp + token_num, h].set(1.0)
        expand = expand.at[h, h * dh:(h + 1) * dh].set(1.0)
        bias = bias.at[0, h * t_kp:h * t_kp + token_num].set(0.0)

    # Fold the 1/sqrt(d_k) attention scale into W_query (constant transform).
    wq_scaled = wq_t * (1.0 / (key_dim ** 0.5))

    return STLParams(
        wq_b=wq_scaled.astype(jnp.bfloat16),
        kblock_b=kblock.astype(jnp.bfloat16),
        bias_f=bias,
        sel_b=sel.astype(jnp.bfloat16),
        vblock_b=vblock.astype(jnp.bfloat16),
        expand_f=expand,
        num_heads=num_heads, t_kp=t_kp, hp=hp, token_num=token_num, E=E,
    )


# ------------------------------ forward wrapper ---------------------------- #
def stl_forward(inputs, params: STLParams):
    """inputs: [N, T_q, E] -> style embedding [N, T_q, E] (f32)."""
    N, T_q, E = inputs.shape
    assert E == params.E
    S = params.num_heads * params.t_kp
    Hp = params.hp

    # Flatten batch*seq into one row axis so each grid step is a large matmul.
    M = N * T_q
    m8 = ((M + 7) // 8) * 8
    # Large blocks amortize the ~0.35us per-step overhead; but never let one
    # block swallow all rows when M > 8 so the grid has >=2 steps (keeps both
    # v7x TensorCores busy under the 'parallel' axis).
    row_block = min(1024, m8)
    if m8 > 8 and pl.cdiv(m8, row_block) < 2:
        row_block = max(8, ((row_block // 2 + 7) // 8) * 8)
    m_pad = pl.cdiv(M, row_block) * row_block

    # bf16 queries: halves query DMA bytes and removes the in-kernel convert.
    x_flat = inputs.reshape(M, E).astype(jnp.bfloat16)
    if m_pad != M:
        x_flat = jnp.pad(x_flat, ((0, m_pad - M), (0, 0)))

    # VMEM budget derived from the actual operand footprint (double-buffered
    # streams + grid-invariant weights), clamped to v7x's 64 MiB.
    bytes_needed = (
        row_block * E * 2 * 2          # query block, bf16, 2 buffers
        + row_block * E * 4 * 2        # output block, f32, 2 buffers
        + (E * E * 2 + E * S * 2 + S * E * 2 + S * Hp * 2
           + Hp * E * 4 + 8 * S * 4) * 2   # grid-invariant operands
    )
    vmem_limit = int(min(64 * 1024 * 1024,
                         max(32 * 1024 * 1024, 2 * bytes_needed)))

    # NOTE: the grid-invariant operands (Wq, Kblk, bias, sel, Vblk, expand)
    # could be single-buffered via pipeline_mode=pl.Buffered(1); at E=32 / S=64
    # the saving is negligible, so it is omitted here.
    out_flat = pl.pallas_call(
        _stl_attention_kernel,
        out_shape=jax.ShapeDtypeStruct((m_pad, E), jnp.float32),
        grid_spec=pltpu.PrefetchScalarGridSpec(
            num_scalar_prefetch=0,
            grid=(m_pad // row_block,),
            in_specs=[
                pl.BlockSpec((row_block, E), lambda i: (i, 0)),  # query rows
                pl.BlockSpec((E, E), lambda i: (0, 0)),          # Wq (scaled)
                pl.BlockSpec((E, S), lambda i: (0, 0)),          # block-diag K^T
                pl.BlockSpec((1, S), lambda i: (0, 0)),          # pad bias row
                pl.BlockSpec((S, Hp), lambda i: (0, 0)),         # denom selector
                pl.BlockSpec((S, E), lambda i: (0, 0)),          # block-diag V
                pl.BlockSpec((Hp, E), lambda i: (0, 0)),         # head expander
            ],
            out_specs=pl.BlockSpec((row_block, E), lambda i: (i, 0)),
        ),
        compiler_params=pltpu.CompilerParams(
            dimension_semantics=("parallel",),
            vmem_limit_bytes=vmem_limit),
    )(x_flat, params.wq_b, params.kblock_b, params.bias_f,
      params.sel_b, params.vblock_b, params.expand_f)

    return out_flat[:M].reshape(N, T_q, E)


# --------------------------- pure-JAX reference ---------------------------- #
def stl_reference(inputs, embed, wq_t, wk_t, wv_t, *, num_heads: int):
    N, T_q, E = inputs.shape
    token_num, key_dim = embed.shape

    keys_in = jnp.tanh(embed)[None].repeat(N, axis=0)           # [N, T_k, E//H]
    q = inputs @ wq_t                                           # [N, T_q, E]
    k = keys_in @ wk_t                                          # [N, T_k, E]
    v = keys_in @ wv_t                                          # [N, T_k, E]

    def split_heads(x):  # [N, T, E] -> [H, N, T, dh]
        return jnp.stack(jnp.split(x, num_heads, axis=2), axis=0)

    qh, kh, vh = split_heads(q), split_heads(k), split_heads(v)
    scores = jnp.einsum("hnqd,hnkd->hnqk", qh, kh) / (key_dim ** 0.5)
    scores = jax.nn.softmax(scores, axis=3)
    out = jnp.einsum("hnqk,hnkd->hnqd", scores, vh)             # [H, N, T_q, dh]
    out = jnp.concatenate(jnp.split(out, num_heads, axis=0), axis=3)[0]
    return out                                                   # [N, T_q, E]


# --------------------------------- main ------------------------------------ #
if __name__ == "__main__":
    # Small, STL-consistent shapes.
    N, T_q = 2, 8
    E = 32
    num_heads = 4
    token_num = 10
    key_dim = E // num_heads       # d_k = E // num_heads

    key = jax.random.PRNGKey(0)
    k_in, k_emb, k_q, k_k, k_v = jax.random.split(key, 5)

    inputs = jax.random.normal(k_in, (N, T_q, E), dtype=jnp.float32)

    # Deterministic parameter init (embed ~ N(0, 0.5) as in the module).
    embed = 0.5 * jax.random.normal(k_emb, (token_num, key_dim), dtype=jnp.float32)
    # nn.Linear weights are [out, in]; we pass their transposes (x @ W^T == x @ wt).
    wq_t = jax.random.normal(k_q, (E, E), dtype=jnp.float32) / jnp.sqrt(E)
    wk_t = jax.random.normal(k_k, (key_dim, E), dtype=jnp.float32) / jnp.sqrt(key_dim)
    wv_t = jax.random.normal(k_v, (key_dim, E), dtype=jnp.float32) / jnp.sqrt(key_dim)

    params = prepare_stl_params(embed, wq_t, wk_t, wv_t, num_heads=num_heads)
    out = stl_forward(inputs, params)
    out = jax.block_until_ready(out)

    ref = stl_reference(inputs, embed, wq_t, wk_t, wv_t, num_heads=num_heads)
    assert out.shape == (N, T_q, E)
    # Tolerance relaxed vs f32 reference because MXU operands are bf16.
    assert jnp.allclose(out, ref, atol=5e-2, rtol=5e-2), "mismatch vs reference"

    print("KERNEL_OK")
</pallas_src>

<mosaic_0001>
module attributes {stable_mosaic.version = 11 : i64} {
  func.func @_stl_attention_kernel(%arg0: i32, %arg1: memref<8x32xbf16, #tpu.memory_space<vmem>>, %arg2: memref<32x32xbf16, #tpu.memory_space<vmem>>, %arg3: memref<32x64xbf16, #tpu.memory_space<vmem>>, %arg4: memref<1x64xf32, #tpu.memory_space<vmem>>, %arg5: memref<64x8xbf16, #tpu.memory_space<vmem>>, %arg6: memref<64x32xbf16, #tpu.memory_space<vmem>>, %arg7: memref<8x32xf32, #tpu.memory_space<vmem>>, %arg8: memref<8x32xf32, #tpu.memory_space<vmem>>) attributes {dimension_semantics = [#tpu.dimension_semantics<parallel>], iteration_bounds = array<i64: 2>, scalar_prefetch = 0 : i64, scratch_operands = 0 : i64, tpu.core_type = #tpu.core_type<tc>, window_params = [{transform_indices = @transform_0, window_bounds = array<i64: 8, 32>}, {pipeline_mode = #tpu.pipeline_mode<synchronous>, transform_indices = @transform_1, window_bounds = array<i64: 32, 32>}, {pipeline_mode = #tpu.pipeline_mode<synchronous>, transform_indices = @transform_2, window_bounds = array<i64: 32, 64>}, {pipeline_mode = #tpu.pipeline_mode<synchronous>, transform_indices = @transform_3, window_bounds = array<i64: 1, 64>}, {pipeline_mode = #tpu.pipeline_mode<synchronous>, transform_indices = @transform_4, window_bounds = array<i64: 64, 8>}, {pipeline_mode = #tpu.pipeline_mode<synchronous>, transform_indices = @transform_5, window_bounds = array<i64: 64, 32>}, {pipeline_mode = #tpu.pipeline_mode<synchronous>, transform_indices = @transform_6, window_bounds = array<i64: 8, 32>}, {transform_indices = @transform_7, window_bounds = array<i64: 8, 32>}]} {
    %c0 = arith.constant 0 : index
    %c0_0 = arith.constant 0 : index
    %0 = vector.load %arg1[%c0, %c0_0] : memref<8x32xbf16, #tpu.memory_space<vmem>>, vector<8x32xbf16>
    %c0_1 = arith.constant 0 : index
    %c0_2 = arith.constant 0 : index
    %1 = vector.load %arg2[%c0_1, %c0_2] : memref<32x32xbf16, #tpu.memory_space<vmem>>, vector<32x32xbf16>
    %cst = arith.constant dense<0.000000e+00> : vector<8x32xf32>
    %2 = tpu.matmul %0, %1, %cst {dimension_numbers = #tpu.dot_dimension_numbers<[1], [0], [0], [1], [0, 0, 1, 1], [], []>} : vector<8x32xbf16>, vector<32x32xbf16>, vector<8x32xf32> -> vector<8x32xf32>
    %3 = arith.truncf %2 : vector<8x32xf32> to vector<8x32xbf16>
    %c0_3 = arith.constant 0 : index
    %c0_4 = arith.constant 0 : index
    %4 = vector.load %arg3[%c0_3, %c0_4] : memref<32x64xbf16, #tpu.memory_space<vmem>>, vector<32x64xbf16>
    %cst_5 = arith.constant dense<0.000000e+00> : vector<8x64xf32>
    %5 = tpu.matmul %3, %4, %cst_5 {dimension_numbers = #tpu.dot_dimension_numbers<[1], [0], [0], [1], [0, 0, 1, 1], [], []>} : vector<8x32xbf16>, vector<32x64xbf16>, vector<8x64xf32> -> vector<8x64xf32>
    %c0_6 = arith.constant 0 : index
    %c0_7 = arith.constant 0 : index
    %6 = vector.load %arg4[%c0_6, %c0_7] : memref<1x64xf32, #tpu.memory_space<vmem>>, vector<1x64xf32>
    %7 = vector.broadcast %6 : vector<1x64xf32> to vector<8x64xf32>
    %8 = arith.addf %5, %7 : vector<8x64xf32>
    %cst_8 = arith.constant dense<0xFF800000> : vector<8xf32>
    %9 = vector.multi_reduction <maximumf>, %8, %cst_8 [1] : vector<8x64xf32> to vector<8xf32>
    %10 = vector.shape_cast %9 : vector<8xf32> to vector<8x1xf32>
    %11 = vector.broadcast %10 : vector<8x1xf32> to vector<8x64xf32>
    %12 = arith.subf %8, %11 : vector<8x64xf32>
    %13 = math.exp %12 : vector<8x64xf32>
    %14 = arith.truncf %13 : vector<8x64xf32> to vector<8x64xbf16>
    %c0_9 = arith.constant 0 : index
    %c0_10 = arith.constant 0 : index
    %15 = vector.load %arg5[%c0_9, %c0_10] : memref<64x8xbf16, #tpu.memory_space<vmem>>, vector<64x8xbf16>
    %cst_11 = arith.constant dense<0.000000e+00> : vector<8x8xf32>
    %16 = tpu.matmul %14, %15, %cst_11 {dimension_numbers = #tpu.dot_dimension_numbers<[1], [0], [0], [1], [0, 0, 1, 1], [], []>} : vector<8x64xbf16>, vector<64x8xbf16>, vector<8x8xf32> -> vector<8x8xf32>
    %cst_12 = arith.constant 1.000000e-30 : f32
    %17 = vector.broadcast %cst_12 : f32 to vector<8x8xf32>
    %18 = arith.maximumf %16, %17 : vector<8x8xf32>
    %19 = tpu.reciprocal %18 {approx = true} : vector<8x8xf32> -> vector<8x8xf32>
    %c0_13 = arith.constant 0 : index
    %c0_14 = arith.constant 0 : index
    %20 = vector.load %arg6[%c0_13, %c0_14] : memref<64x32xbf16, #tpu.memory_space<vmem>>, vector<64x32xbf16>
    %cst_15 = arith.constant dense<0.000000e+00> : vector<8x32xf32>
    %21 = tpu.matmul %14, %20, %cst_15 {dimension_numbers = #tpu.dot_dimension_numbers<[1], [0], [0], [1], [0, 0, 1, 1], [], []>} : vector<8x64xbf16>, vector<64x32xbf16>, vector<8x32xf32> -> vector<8x32xf32>
    %c0_16 = arith.constant 0 : index
    %c0_17 = arith.constant 0 : index
    %22 = vector.load %arg7[%c0_16, %c0_17] : memref<8x32xf32, #tpu.memory_space<vmem>>, vector<8x32xf32>
    %cst_18 = arith.constant dense<0.000000e+00> : vector<8x32xf32>
    %23 = tpu.matmul %19, %22, %cst_18 {dimension_numbers = #tpu.dot_dimension_numbers<[1], [0], [0], [1], [0, 0, 1, 1], [], []>} : vector<8x8xf32>, vector<8x32xf32>, vector<8x32xf32> -> vector<8x32xf32>
    %24 = arith.mulf %21, %23 : vector<8x32xf32>
    %c0_19 = arith.constant 0 : index
    %c0_20 = arith.constant 0 : index
    %25 = vector.load %arg8[%c0_19, %c0_20] : memref<8x32xf32, #tpu.memory_space<vmem>>, vector<8x32xf32>
    tpu.vector_store %arg8[%c0_19, %c0_20], %24 {strides = array<i32>} : memref<8x32xf32, #tpu.memory_space<vmem>>, vector<8x32xf32>,
    return
  }
  func.func @transform_0(%arg0: i32) -> (i32, i32) {
    %c0_i32 = arith.constant 0 : i32
    %c0_i32_0 = arith.constant 0 : i32
    return %arg0, %c0_i32 : i32, i32
  }
  func.func @transform_1(%arg0: i32) -> (i32, i32) {
    %c0_i32 = arith.constant 0 : i32
    %c0_i32_0 = arith.constant 0 : i32
    %c0_i32_1 = arith.constant 0 : i32
    return %c0_i32, %c0_i32_0 : i32, i32
  }
  func.func @transform_2(%arg0: i32) -> (i32, i32) {
    %c0_i32 = arith.constant 0 : i32
    %c0_i32_0 = arith.constant 0 : i32
    %c0_i32_1 = arith.constant 0 : i32
    return %c0_i32, %c0_i32_0 : i32, i32
  }
  func.func @transform_3(%arg0: i32) -> (i32, i32) {
    %c0_i32 = arith.constant 0 : i32
    %c0_i32_0 = arith.constant 0 : i32
    %c0_i32_1 = arith.constant 0 : i32
    return %c0_i32, %c0_i32_0 : i32, i32
  }
  func.func @transform_4(%arg0: i32) -> (i32, i32) {
    %c0_i32 = arith.constant 0 : i32
    %c0_i32_0 = arith.constant 0 : i32
    %c0_i32_1 = arith.constant 0 : i32
    return %c0_i32, %c0_i32_0 : i32, i32
  }
  func.func @transform_5(%arg0: i32) -> (i32, i32) {
    %c0_i32 = arith.constant 0 : i32
    %c0_i32_0 = arith.constant 0 : i32
    %c0_i32_1 = arith.constant 0 : i32
    return %c0_i32, %c0_i32_0 : i32, i32
  }
  func.func @transform_6(%arg0: i32) -> (i32, i32) {
    %c0_i32 = arith.constant 0 : i32
    %c0_i32_0 = arith.constant 0 : i32
    %c0_i32_1 = arith.constant 0 : i32
    return %c0_i32, %c0_i32_0 : i32, i32
  }
  func.func @transform_7(%arg0: i32) -> (i32, i32) {
    %c0_i32 = arith.constant 0 : i32
    %c0_i32_0 = arith.constant 0 : i32
    return %arg0, %c0_i32 : i32, i32
  }
}

</mosaic_0001>

<bundles_post_ra>
// kernel: tpu_custom_call.1
= control target key start
LH: loop header
LB: loop body
LE: loop exit
PB: predicated region body
PF: predicated region fallthrough
CT: control target
= control target key end

     0   :  { %12 = vsyncpa [#allocation3], 0  ;;  %s1127_s0 = inlined_call_operand.vmem [shape: bf16[16,32], index: 0, kind: input, shape index: {}]   ;;  %s1128_s1 = inlined_call_operand.vmem [shape: bf16[32,32], index: 1, kind: input, shape index: {}]   ;;  %s1129_s2 = inlined_call_operand.vmem [shape: bf16[32,64], index: 2, kind: input, shape index: {}]   ;;  %s1130_s3 = inlined_call_operand.vmem [shape: f32[1,64], index: 3, kind: input, shape index: {}]   ;;  %s1131_s4 = inlined_call_operand.vmem [shape: bf16[64,8], index: 4, kind: input, shape index: {}]   ;;  %s1132_s5 = inlined_call_operand.vmem [shape: bf16[64,32], index: 5, kind: input, shape index: {}]   ;;  %s1133_s6 = inlined_call_operand.vmem [shape: f32[8,32], index: 6, kind: input, shape index: {}]   ;;  %s1134_s7 = inlined_call_operand.hbm [shape: f32[16,32], index: 7, kind: output, shape index: {}]  }
   0x1   :  { %14 = vsyncpa [#allocation3 + $0x1], 0  ;;  %s963_s24 = smov 0   ;;  %s965_s25 = smov 0  }
   0x2   :  { %s967_s26 = smov 0   ;;  %s969_s27 = smov 0  }
   0x3 LB: > { %s984_s28 = sadd.s32 4294967295, %s918_s27   ;;  %s710_s29 = sadd.s32 4294967294, %s918_s27   ;;  %s918_s27 = sphi %s969_s27, %s1140_s27   ;;  %s914_s26 = sphi %s967_s26, %s1139_s26   ;;  %s910_s25 = sphi %s965_s25, %s1138_s25   ;;  %s906_s24 = sphi %s963_s24, %s1137_s24  }
   0x4   : > { %s988_s30 = sadd.s32 1, %s918_s27   ;;  %s179_s8 = sadd.s32 1, %s914_s26 }
   0x5   : > { %s176_s9 = ssub.s32 %s918_s27, %s988_s30  ;;  %p189_p0 = scmp.ne.s32.totalorder %s914_s26, %s910_s25 }
   0x6   : > { %p177_p1 = scmp.eq.s32.totalorder %s176_s9, 0  ;;  %p190_p2 = scmp.eq.s32.totalorder %s984_s28, 1 }
   0x7   : > { %p195_p3 = scmp.ne.s32.totalorder %s910_s25, %s906_s24  ;;  %p196_p4 = scmp.eq.s32.totalorder %s710_s29, 1 }
   0x8   : > { %s999_s10 = scalar_select %p177_p1, %s914_s26, %s179_s8  }
   0x9   : > { %p1001_p5 = por %p190_p2, %p189_p0  ;;  %p1005_p6 = por %p196_p4, %p195_p3 }
   0xa   : > { %p713_p7 = scmp.ge.s32.totalorder %s918_s27, 1  ;;  %p239_p8 = scmp.lt.s32.totalorder %s918_s27, 3 }
   0xc   : > { %p240_p9 = pnand %p713_p7, %p239_p8 }
   0xd   : > { %p270_p10 = scmp.lt.s32.totalorder (!%p240_p9), %s984_s28, 1  ;;  %s267_s18 = sand.u32 (!%p240_p9), 1, %s910_s25  }
   0xe   : > { %243 = sbr.rel (%p240_p9) target bundleno = 994 (0x3e2), region = 48  ;;  %s638_s9 = scalar_lea.sflag (!%p240_p9), [#allocation3], %s267_s18 }
  0x13   : > { %v842_v0 = vld [vmem:[%s1128_s1 + $0x8] sm:$0xff]   ;;  %v920_v1 = vmov 0.0   ;;  %v843_v2 = vld [vmem:[%s1128_s1] sm:$0xff]   ;;  %vm921_vm0 = vmmov 0   ;;  %s271_s19 = scalar_select %p270_p10, %s984_s28, 1  ;;  %vm292_vm1 = vcmask 261120  }
  0x14   : > { %756 = vmatprep.subr.bf16.mxu0 %v920_v1  ;;  %764 = vmatprep.subr.bf16.mxu1 %v920_v1  ;;  %v844_v3 = vld [vmem:[%s1129_s2 + $0x8] sm:$0xff]   ;;  %v845_v5 = vld [vmem:[%s1129_s2] sm:$0xff]   ;;  %vm403_vm2 = vcmask 523264   ;;  %v846_v18 = vld [vmem:[%s1131_s4 + $0x18] sm:$0xff]   ;;  %vm561_vm3 = vcmask 64512  }
  0x15   : > { %757 = vmatpush3.bf16.msra.mxu0 %v842_v0  ;;  %760 = vmatprep.mubr.msk.bf16.mxu0 %vm921_vm0, %v920_v1  ;;  %s715_s20 = sshll.u32 %s271_s19, 2  ;;  %v719_v11 = vld [vmem:[%s1130_s3] ss:$0 sm:$0xff]  ;;  %v847_v19 = vld [vmem:[%s1132_s5 + $0x18] sm:$0xff]   ;;  %v848_v20 = vld [vmem:[%s1131_s4 + $0x10] sm:$0xff]   ;;  %s714_s19 = sshll.u32 %s267_s18, 3 }
  0x16   : > { %758 = vmatprep.subr.bf16.mxu0 %v920_v1  ;;  %768 = vmatprep.mubr.msk.bf16.mxu1 %vm921_vm0, %v920_v1  ;;  %s273_s23 = scalar_lea.vmem %s1127_s0, %s715_s20  ;;  %v849_v21 = vld [vmem:[%s1132_s5 + $0x10] sm:$0xff]   ;;  %v850_v22 = vld [vmem:[%s1131_s4 + $0x8] sm:$0xff]   ;;  %v852_v24 = vld [vmem:[%s1131_s4] sm:$0xff]   ;;  %s735_s20 = sshll.u32 %s984_s28, 7 }
  0x17   : > { %765 = vmatpush3.bf16.msra.mxu1 %v844_v3  ;;  %v275_v4 = vld [vmem:[%s273_s23] sm:$0xf]  ;;  %v851_v23 = vld [vmem:[%s1132_s5 + $0x8] sm:$0xff]   ;;  %s269_s21 = scalar_lea.vmem [#allocation2], %s714_s19  ;;  %s1091_s8 = scalar_lea.hbm %s1134_s7, %s735_s20 }
  0x18   : > { %766 = vmatprep.subr.bf16.mxu1 %v920_v1  ;;  %v853_v25 = vld [vmem:[%s1132_s5] sm:$0xff]   ;;  %s651_s22 = sshll.u32 %s269_s21, 4  ;;  %s922_s28 = smov [#allocation2]   ;;  %s652_s22 = int_to_ptr.vmem [resolvable:$true] %s651_s22 }
  0x19   : > { %759 = vmatpush3.bf16.msra.mxu0 %v843_v2  ;;  %v560_v31 = vld [vmem:[%s1133_s6] sm:$0xff]  ;;  %s858_s13 = scalar_lea.vmem %s652_s22, 128  ;;  %s862_s14 = sshll.u32 %s922_s28, 4  ;;  %s863_s14 = int_to_ptr.vmem [resolvable:$false] %s862_s14 }
  0x1a   : > { %772 = vmatprep.subr.bf16.mxu0 %v920_v1  ;;  %p859_p11 = scmp.ne.s32.totalorder %s652_s22, %s858_s13  ;;  %s864_s15 = scalar_lea.vmem %s863_s14, 256 }
  0x1b   : > { %767 = vmatpush3.bf16.msra.mxu1 %v845_v5  ;;  %p865_p0 = scmp.lt.s32.totalorder %s652_s22, %s863_s14  ;;  %p866_p1 = scmp.lt.s32.totalorder %s864_s15, %s858_s13 }
  0x1c   : > { %761 = vmatmul.mubr.msk.bf16.vlgmr.msra.gmra.mxu0 %vm292_vm1, %v275_v4  ;;  %784 = vmatprep.subr.bf16.mxu1 %v920_v1  ;;  %p860_p12 = pnand %p859_p11, %p1001_p5 }
  0x1d   : > { %780 = vmatprep.mubr.msk.bf16.mxu0 %vm921_vm0, %v920_v1  ;;  %773 = vmatpush3.bf16.msra.mxu0 %v846_v18  ;;  %p867_p2 = por %p866_p1, %p865_p0 }
  0x1e   : > { %774 = vmatprep.subr.bf16.mxu0 %v920_v1  ;;  %p861_p13 = pneg %p860_p12 }
  0x20   : > { %p868_p3 = pnand %p867_p2, %p861_p13 }
  0x21   : > { %775 = vmatpush3.bf16.msra.mxu0 %v848_v20 }
  0x22   : > { %776 = vmatprep.subr.bf16.mxu0 %v920_v1 }
  0x25   : > { %777 = vmatpush3.bf16.msra.mxu0 %v850_v22 }
  0x26   : > { %778 = vmatprep.subr.bf16.mxu0 %v920_v1 }
  0x29   : > { %779 = vmatpush3.bf16.msra.mxu0 %v852_v24 }
  0x2a   : > { %796 = vmatprep.subr.mxu0 %v920_v1 }
  0xdc   : > { %v330_v6 = vpop.f32.mrf.mxu0 }
  0xdd   : > { %v336_v7 = vpack.c.bf16 %v330_v6, %v330_v6 }
  0xde   : > { %v762_v8 = vpop.f32.mrf.mxu0 }
  0xdf   : > { %769 = vmatmul.mubr.msk.bf16.vlgmr.msra.gmra.mxu1 %vm292_vm1, %v336_v7 }
  0xe0   : > { %v333_v9 = vpop.f32.mrf.mxu0  ;;  %792 = vmatprep.mubr.msk.bf16.mxu1 %vm921_vm0, %v920_v1  ;;  %785 = vmatpush3.bf16.msra.mxu1 %v847_v19 }
  0xe1   : > { %786 = vmatprep.subr.bf16.mxu1 %v920_v1 }
  0xe2   : > { %v763_v10 = vpop.f32.mrf.mxu0 }
  0xe4   : > { %787 = vmatpush3.bf16.msra.mxu1 %v849_v21 }
  0xe5   : > { %788 = vmatprep.subr.bf16.mxu1 %v920_v1 }
  0xe8   : > { %789 = vmatpush3.bf16.msra.mxu1 %v851_v23 }
  0xe9   : > { %790 = vmatprep.subr.bf16.mxu1 %v920_v1 }
  0xec   : > { %791 = vmatpush3.bf16.msra.mxu1 %v853_v25 }
 0x19f   : > { %v397_v12 = vpop.f32.mrf.mxu1 }
 0x1a0   : > { %v398_v13 = vadd.f32 %v719_v11, %v397_v12 }
 0x1a1   : > { %v770_v14 = vpop.f32.mrf.mxu1 }
 0x1a2   : > { %v404_v15 = vsel %vm403_vm2, %v398_v13, -inf }
 0x1a3   : > { %v400_v16 = vpop.f32.mrf.mxu1  ;;  %405 = vmax.xlane.f32.xlu0 %v404_v15 }
 0x1a5   : > { %v771_v17 = vpop.f32.mrf.mxu1 }
 0x22c   : > { %v406_v26 = vpop.xlane.xlu0 %405 }
 0x22d   : > { %v407_v27 = vsub.f32 %v398_v13, %v406_v26 }
 0x22f   : > { %v408_v28 = vmul.f32 1.442695, %v407_v27 }
 0x231   : > { %854 = vpow2.f32 %v408_v28 }
 0x23e   : > { %v855_v29 = vpop.eup %854 }
 0x23f   : > { %v410_v30 = vpack.c.bf16 %v855_v29, %v855_v29 }
 0x241   : > { %781 = vmatmul.mubr.msk.bf16.vlgmr.msra.gmra.mxu0 %vm403_vm2, %v410_v30  ;;  %793 = vmatmul.mubr.msk.bf16.vlgmr.msra.gmra.mxu1 %vm403_vm2, %v410_v30 }
 0x242   : > { %798 = vmatprep.mubr.msk.f32.mxu0 %vm921_vm0, %v920_v1  ;;  %797 = vmatpush3.msra.mxu0 %v560_v31 }
 0x301   : > { %v480_v32 = vpop.f32.mrf.mxu0  ;;  %v554_v33 = vpop.f32.mrf.mxu1 }
 0x302   : > { %v486_v34 = vmax.f32 %v480_v32, 1e-30 }
 0x303   : > { %v782_v35 = vpop.f32.mrf.mxu0  ;;  %v794_v36 = vpop.f32.mrf.mxu1 }
 0x304   : > { %856 = vrcp.f32 %v486_v34 }
 0x305   : > { %v483_v37 = vpop.f32.mrf.mxu0  ;;  %v557_v38 = vpop.f32.mrf.mxu1 }
 0x307   : > { %v783_v39 = vpop.f32.mrf.mxu0  ;;  %v795_v40 = vpop.f32.mrf.mxu1 }
 0x311   : > { %v857_v41 = vpop.eup %856 }
 0x312   : > { %799 = vmatmul.mubr.msk.f32.vlgmr.msra.gmra.mxu0 %vm561_vm3, %v857_v41 }
 0x3d2   : > { %v631_v42 = vpop.f32.mrf.mxu0 }
 0x3d3   : > { %v635_v43 = vmul.f32 %v631_v42, %v554_v33 }
 0x3d4   : > { %v800_v44 = vpop.f32.mrf.mxu0 }
 0x3d5   : > { %636 = vst.msk [vmem:[%s269_s21] sm:$0xff] %vm292_vm1, %v635_v43 }
 0x3d6   : > { %871 = shalt.err (!%p868_p3)
}
 0x3d7   : > { %s872_s16 = scalar_lea.hbm %s1091_s8, 128  ;;  %s876_s19 = scalar_lea.hbm %s1134_s7, 256 }
 0x3d8   : > { %p873_p4 = scmp.ne.s32.totalorder %s1091_s8, %s872_s16  ;;  %p877_p9 = scmp.lt.s32.totalorder %s1091_s8, %s1134_s7 }
 0x3d9   : > { %p878_p10 = scmp.lt.s32.totalorder %s876_s19, %s872_s16 }
 0x3da   : > { %p874_p7 = pnand %p873_p4, %p1001_p5 }
 0x3db   : > { %p879_p11 = por %p878_p10, %p877_p9 }
 0x3dc   : > { %p875_p8 = pneg %p874_p7 }
 0x3de   : > { %p880_p12 = pnand %p879_p11, %p875_p8 }
 0x3e0   : > { %883 = shalt.err (!%p880_p12)
}
 0x3e1   : > { %801 = dma.vmem_to_hbm [thread:$0]  (%p1001_p5), %s652_s22, 128, %s1091_s8, %s638_s9  }
 0x3e2 PF: > { %p807_p13 = scmp.ge.s32.totalorder %s918_s27, 2  ;;  %s663_s23 = sand.u32 1, %s906_s24  }
 0x3e3   : > { %s664_s29 = scalar_lea.sflag [#allocation3], %s663_s23 }
 0x3e4   : > { %p804_p0 = pnand %p807_p13, %p1005_p6 }
 0x3e6   : > { %p805_p1 = pneg %p804_p0 }
 0x3e8   : > { %901 = dma.done.wait (%p805_p1), %s664_s29, 128  }
 0x3e9   : > { %903 = vsyncadd (%p805_p1), %s664_s29, 4294967168  ;;  %p17_p2 = scmp.ge.s32.totalorder %s988_s30, 4   ;;  %s1137_s24 = smov %s910_s25 }
 0x3ea   : > { %s1138_s25 = smov %s914_s26  ;;  %s1139_s26 = smov %s999_s10 }
 0x3eb   : > { %s1140_s27 = smov %s988_s30  ;;  %19 = sbr.rel (!%p17_p2) target bundleno = 3 (0x3), region = 83 }
 0x3f0   :  { %669 = vsyncpa [#allocation3], 1 }
 0x3f1   :  { %671 = vsyncpa [#allocation3 + $0x1], 1 }

</bundles_post_ra>
